<compile_context>
chip_gen: v7x
topology: tpu7x:2x2x1
jax: 0.10.0
libtpu: 0.0.40
codegen_flags: <defaults>
</compile_context>

<pallas_src>
import jax
import jax.numpy as jnp
from jax.experimental import pallas as pl
from jax.experimental.pallas import tpu as pltpu


def _make_kernel(*, nk, use_mask, use_acc, scale):
    """Build the matmul(+dropout) kernel for a given static configuration."""
    scale_f = float(scale)

    def _epilogue(res, m_ref, o_ref):
        if use_mask:
            res = res * m_ref[...].astype(jnp.float32) * jnp.float32(scale_f)
        o_ref[...] = res.astype(o_ref.dtype)

    def kernel(*refs):
        if use_mask:
            a_ref, e_ref, m_ref = refs[0], refs[1], refs[2]
            rest = refs[3:]
        else:
            a_ref, e_ref = refs[0], refs[1]
            m_ref = None
            rest = refs[2:]
        o_ref = rest[0]

        partial = jnp.dot(a_ref[...], e_ref[...],
                          preferred_element_type=jnp.float32)

        if use_acc:
            acc_ref = rest[1]
            k = pl.program_id(2)

            @pl.when(k == 0)
            def _():
                acc_ref[...] = jnp.zeros_like(acc_ref)

            acc_ref[...] += partial

            @pl.when(k == nk - 1)
            def _():
                _epilogue(acc_ref[...], m_ref, o_ref)
        else:
            # k grid collapsed to 1: write once, no scratch accumulator.
            _epilogue(partial, m_ref, o_ref)

    return kernel


def _pick_tile(dim, target, align=128):
    """Largest multiple of `align` that divides `dim` and is <= target.
    Falls back to `dim` itself (full-extent block) if none exists."""
    t = min(int(target), int(dim))
    t -= t % align
    while t >= align:
        if dim % t == 0:
            return t
        t -= align
    return int(dim)


def aggregator_forward(ego_embeddings, a_in, *, dropout_rate=0.0,
                       training=False, rng_key=None,
                       tm=512, tn=512, tk=512):
    """out = Dropout(p)(a_in @ ego_embeddings)."""
    N, D = ego_embeddings.shape
    assert a_in.shape == (N, N)
    out_dtype = ego_embeddings.dtype

    # Tile selection: big blocks to amortize per-grid-step overhead, tn -> D
    # when D is small so A_in is streamed exactly once.
    tm = _pick_tile(N, tm)
    tk = _pick_tile(N, tk)
    tn = _pick_tile(D, tn)
    # Keep >= 2 programs on the i axis so megacore / v7x 2-TC sharding can
    # split the grid (unless N itself is a single tile).
    if N // tm < 2 and N >= 256:
        tm2 = _pick_tile(N, max(128, N // 2))
        if tm2 >= 128:
            tm = tm2

    gm, gn, gk = N // tm, D // tn, N // tk
    use_acc = gk > 1
    use_mask = bool(training) and float(dropout_rate) > 0.0

    # Mem-bound: stream both operands in bf16, accumulate in f32 on the MXU.
    a_bf = a_in.astype(jnp.bfloat16)
    e_bf = ego_embeddings.astype(jnp.bfloat16)

    inputs = [a_bf, e_bf]
    in_specs = [
        pl.BlockSpec((tm, tk), lambda i, j, k: (i, k)),
        pl.BlockSpec((tk, tn), lambda i, j, k: (k, j)),
    ]

    scale = 1.0
    if use_mask:
        # TODO(synk): mask values differ from torch's RNG stream (semantics match).
        if rng_key is None:
            rng_key = jax.random.PRNGKey(0)
        scale = 1.0 / (1.0 - float(dropout_rate))
        keep = jax.random.bernoulli(rng_key, 1.0 - float(dropout_rate), (N, D))
        inputs.append(keep.astype(jnp.bfloat16))
        in_specs.append(pl.BlockSpec((tm, tn), lambda i, j, k: (i, j)))

    scratch = [pltpu.VMEM((tm, tn), jnp.float32)] if use_acc else []

    kernel = _make_kernel(nk=gk, use_mask=use_mask, use_acc=use_acc,
                          scale=scale)

    # Explicit VMEM budget: double-buffered inputs/output (+mask) + accumulator.
    out_bytes = jnp.dtype(out_dtype).itemsize
    vmem_needed = 2 * (tm * tk * 2 + tk * tn * 2 + tm * tn * out_bytes
                       + (tm * tn * 2 if use_mask else 0))
    if use_acc:
        vmem_needed += tm * tn * 4
    vmem_limit = min(max(2 * vmem_needed + (8 << 20), 32 << 20), 64 << 20)

    return pl.pallas_call(
        kernel,
        out_shape=jax.ShapeDtypeStruct((N, D), out_dtype),
        grid_spec=pltpu.PrefetchScalarGridSpec(
            num_scalar_prefetch=0,
            grid=(gm, gn, gk),
            in_specs=in_specs,
            out_specs=pl.BlockSpec((tm, tn), lambda i, j, k: (i, j)),
            scratch_shapes=scratch,
        ),
        compiler_params=pltpu.CompilerParams(
            dimension_semantics=("parallel", "parallel", "arbitrary"),
            vmem_limit_bytes=vmem_limit),
    )(*inputs)


if __name__ == "__main__":
    # Small shapes consistent with the module: N nodes x dim embedding,
    # dense adjacency A_in of shape (N, N).
    N, dim = 256, 128
    dropout = 0.1

    key = jax.random.PRNGKey(0)
    k1, k2, k3 = jax.random.split(key, 3)
    ego_embeddings = jax.random.normal(k1, (N, dim), dtype=jnp.float32)
    a_in = jax.random.normal(k2, (N, N), dtype=jnp.float32)

    # Eval-mode forward (dropout is identity) — check against plain JAX
    # (bf16 inputs + f32 accumulation -> loose relative tolerance).
    out_eval = aggregator_forward(ego_embeddings, a_in,
                                  dropout_rate=dropout, training=False)
    jax.block_until_ready(out_eval)
    ref = a_in @ ego_embeddings
    rel_err = float(jnp.max(jnp.abs(out_eval - ref)) /
                    (jnp.max(jnp.abs(ref)) + 1e-6))
    assert rel_err < 2e-2, f"matmul mismatch, rel err {rel_err}"

    # Training-mode forward (dropout active, mask from jax.random).
    out_train = aggregator_forward(ego_embeddings, a_in,
                                   dropout_rate=dropout, training=True,
                                   rng_key=k3)
    jax.block_until_ready(out_train)
    zero_frac = float(jnp.mean(out_train == 0.0))
    assert 0.0 < zero_frac < 0.5, f"unexpected dropout zero fraction {zero_frac}"

    print("KERNEL_OK")
</pallas_src>

<mosaic_0001>
module attributes {stable_mosaic.version = 11 : i64} {
  func.func @kernel(%arg0: i32, %arg1: i32, %arg2: i32, %arg3: memref<128x256xbf16, #tpu.memory_space<vmem>>, %arg4: memref<256x128xbf16, #tpu.memory_space<vmem>>, %arg5: memref<128x128xf32, #tpu.memory_space<vmem>>) attributes {dimension_semantics = [#tpu.dimension_semantics<parallel>, #tpu.dimension_semantics<parallel>, #tpu.dimension_semantics<arbitrary>], iteration_bounds = array<i64: 2, 1, 1>, scalar_prefetch = 0 : i64, scratch_operands = 0 : i64, tpu.core_type = #tpu.core_type<tc>, window_params = [{transform_indices = @transform_0, window_bounds = array<i64: 128, 256>}, {transform_indices = @transform_1, window_bounds = array<i64: 256, 128>}, {transform_indices = @transform_2, window_bounds = array<i64: 128, 128>}]} {
    %c0 = arith.constant 0 : index
    %c0_0 = arith.constant 0 : index
    %0 = vector.load %arg3[%c0, %c0_0] : memref<128x256xbf16, #tpu.memory_space<vmem>>, vector<128x256xbf16>
    %c0_1 = arith.constant 0 : index
    %c0_2 = arith.constant 0 : index
    %1 = vector.load %arg4[%c0_1, %c0_2] : memref<256x128xbf16, #tpu.memory_space<vmem>>, vector<256x128xbf16>
    %cst = arith.constant dense<0.000000e+00> : vector<128x128xf32>
    %2 = tpu.matmul %0, %1, %cst {dimension_numbers = #tpu.dot_dimension_numbers<[1], [0], [0], [1], [0, 0, 1, 1], [], []>} : vector<128x256xbf16>, vector<256x128xbf16>, vector<128x128xf32> -> vector<128x128xf32>
    %c0_3 = arith.constant 0 : index
    %c0_4 = arith.constant 0 : index
    %3 = vector.load %arg5[%c0_3, %c0_4] : memref<128x128xf32, #tpu.memory_space<vmem>>, vector<128x128xf32>
    tpu.vector_store %arg5[%c0_3, %c0_4], %2 {strides = array<i32>} : memref<128x128xf32, #tpu.memory_space<vmem>>, vector<128x128xf32>,
    return
  }
  func.func @transform_0(%arg0: i32, %arg1: i32, %arg2: i32) -> (i32, i32) {
    %c0_i32 = arith.constant 0 : i32
    return %arg0, %arg2 : i32, i32
  }
  func.func @transform_1(%arg0: i32, %arg1: i32, %arg2: i32) -> (i32, i32) {
    %c0_i32 = arith.constant 0 : i32
    return %arg2, %arg1 : i32, i32
  }
  func.func @transform_2(%arg0: i32, %arg1: i32, %arg2: i32) -> (i32, i32) {
    %c0_i32 = arith.constant 0 : i32
    return %arg0, %arg1 : i32, i32
  }
}

</mosaic_0001>

<bundles_post_ra>
// kernel: tpu_custom_call.1
= control target key start
LH: loop header
LB: loop body
LE: loop exit
PB: predicated region body
PF: predicated region fallthrough
CT: control target
= control target key end

     0   :  { %7 = vsyncpa [#allocation3], 0  ;;  %s1356_s0 = inlined_call_operand.hbm [shape: bf16[256,256], index: 0, kind: input, shape index: {}]   ;;  %s1357_s1 = inlined_call_operand.hbm [shape: bf16[256,128], index: 1, kind: input, shape index: {}]   ;;  %s1358_s2 = inlined_call_operand.hbm [shape: f32[256,128], index: 2, kind: output, shape index: {}]  }
   0x1   :  { %9 = vsyncpa [#allocation3 + $0x1], 0 }
   0x2   :  { %10 = vsyncpa [#allocation6], 0 }
   0x3   :  { %11 = vsyncpa [#allocation4], 0 }
   0x4   :  { %13 = vsyncpa [#allocation4 + $0x1], 0  ;;  %s1096_s9 = smov 0   ;;  %s1098_s10 = smov 0  }
   0x5   :  { %s1100_s11 = smov 0   ;;  %s1102_s12 = smov 0  }
   0x6   :  { %s1104_s13 = smov 0   ;;  %s1106_s14 = smov 0  }
   0x7 LB: > { %s674_s15 = sadd.s32 4294967295, %s1070_s14   ;;  %s675_s16 = sadd.s32 4294967294, %s1070_s14   ;;  %s1070_s14 = sphi %s1106_s14, %s19_s14   ;;  %s1066_s13 = sphi %s1104_s13, %s1382_s13   ;;  %s1062_s12 = sphi %s1102_s12, %s1381_s12   ;;  %s1058_s11 = sphi %s1100_s11, %s1380_s11   ;;  %s1054_s10 = sphi %s1098_s10, %s1379_s10   ;;  %s1050_s9 = sphi %s1096_s9, %s1378_s9  }
   0x8   : > { %p60_p0 = scmp.ne.s32.totalorder %s1054_s10, %s1050_s9  ;;  %p1130_p1 = scmp.eq.s32.totalorder %s674_s15, 0 }
   0x9   : > { %p1134_p2 = scmp.eq.s32.totalorder %s674_s15, 1  ;;  %p120_p3 = scmp.eq.s32.totalorder %s675_s16, 1 }
   0xa   : > { %s1363_s17 = scalar_select %p1130_p1, 1, 0 }
   0xb   : > { %s1364_s18 = scalar_select %p1134_p2, 1, 0 }
   0xc   : > { %p1140_p4 = por %p1130_p1, %p60_p0  ;;  %p676_p5 = scmp.ge.s32.totalorder %s1070_s14, 1 }
   0xd   : > { %p1145_p6 = por %p120_p3, %p60_p0  ;;  %p127_p7 = scmp.lt.s32.totalorder %s1070_s14, 3 }
   0xe   : > { %s1365_s19 = scalar_select %p1140_p4, 1, 0 }
   0xf   : > { %s1366_s20 = scalar_select %p1145_p6, 1, 0 }
  0x10   : > { %p1150_p8 = pnand %p676_p5, %p127_p7  ;;  %s1072_s22 = smov [#allocation5]  }
  0x11   : > { %s143_s23 = sshll.u32 %s1072_s22, 4  ;;  %s38_s25 = sadd.s32 1, %s1066_s13  ;;  %s144_s23 = int_to_ptr.vmem [resolvable:$true] %s143_s23 }
  0x12   : > { %s1367_s21 = scalar_select %p1150_p8, 1, 0 }
  0x13   : > { %p815_p9 = pneg %p1150_p8  ;;  %s926_s28 = scalar_lea.hbm %s1357_s1, 2048 }
  0x14   : > { %p927_p12 = scmp.ne.s32.totalorder %s1357_s1, %s926_s28  ;;  %p933_p5 = scmp.lt.u32.totalorder %s926_s28, %s1357_s1 }
  0x15   : > { %p1159_p11 = pnand %p815_p9, %p1130_p1 }
  0x17   : > { %p928_p13 = pneg %p1159_p11 }
  0x19   : > { %p929_p0 = pnand %p928_p13, %p927_p12 }
  0x1b   : > { %p930_p3 = pneg %p929_p0 }
  0x1d   : > { %p935_p7 = pnand %p933_p5, %p930_p3 }
  0x1f   : > { %938 = shalt.err (!%p935_p7)
}
  0x20   : > { %s939_s5 = scalar_lea.vmem %s144_s23, 2048  ;;  %p947_p1 = scmp.lt.s32.totalorder %s144_s23, %s144_s23 }
  0x21   : > { %p940_p9 = scmp.ne.s32.totalorder %s144_s23, %s939_s5  ;;  %p948_p4 = scmp.lt.s32.totalorder %s939_s5, %s939_s5 }
  0x23   : > { %p942_p10 = pnand %p940_p9, %p928_p13  ;;  %p949_p8 = por %p948_p4, %p947_p1 }
  0x25   : > { %p943_p6 = pneg %p942_p10 }
  0x27   : > { %p950_p2 = pnand %p949_p8, %p943_p6 }
  0x29   : > { %953 = shalt.err (!%p950_p2)
}
  0x2a   : > { %s1073_s6 = smov 64   ;;  %s1074_s7 = smov 4  }
  0x2b   : > { %818 = dma.hbm_to_vmem [thread:$0]  (!%p1159_p11), %s1357_s1, 2048, %s144_s23, [#allocation6], %s1073_s6, %s1073_s6, %s1074_s7  }
  0x2c   : > { %p40_p1 = scmp.ge.s32.totalorder %s38_s25, 2  ;;  %s47_s16 = sadd.s32 1, %s1058_s11 }
  0x2d   : > { %p54_p2 = scmp.ne.s32.totalorder %s1058_s11, %s1054_s10  ;;  %p55_p4 = scmp.eq.s32.totalorder %s1070_s14, 0 }
  0x2e   : > { %s1384_s25 = smov (%p40_p1, %s38_s25), 0  ;;  %p1370_p8 = scmp.ne.s32.totalorder %s1364_s18, 0 }
  0x2f   : > { %p1186_p6 = por %p55_p4, %p54_p2  ;;  %s42_s24 = ssub.s32 %s1066_s13, %s1384_s25 }
  0x30   : > { %p1192_p10 = por %p1370_p8, %p54_p2  ;;  %p828_p12 = scmp.lt.s32.totalorder %s1070_s14, 2 }
  0x31   : > { %p45_p11 = scmp.eq.s32.totalorder %s42_s24, 0  ;;  %s157_s23 = sand.u32 1, %s1058_s11  }
  0x32   : > { %s679_s27 = sshll.u32 %s157_s23, 7  ;;  %s725_s29 = sshll.u32 %s1066_s13, 11 }
  0x33   : > { %s1201_s28 = scalar_select %p45_p11, %s1058_s11, %s47_s16  }
  0x34   : > { %s1207_s4 = scalar_lea.hbm %s1356_s0, %s725_s29  ;;  %s161_s18 = scalar_lea.vmem [#allocation2], %s679_s27 }
  0x35   : > { %s171_s5 = sshll.u32 %s161_s18, 4  ;;  %p1213_p13 = pnand %p828_p12, %p1186_p6  ;;  %s1209_s5 = int_to_ptr.vmem [resolvable:$true] %s171_s5 }
  0x36   : > { %s1217_s7 = scalar_lea.sflag [#allocation3], %s157_s23  ;;  %s954_s8 = scalar_lea.hbm %s1207_s4, 2048 }
  0x37   : > { %p955_p0 = scmp.ne.s32.totalorder %s1207_s4, %s954_s8  ;;  %p956_p3 = pneg %p1213_p13 }
  0x38   : > { %s959_s22 = scalar_lea.hbm %s1356_s0, 4096  ;;  %p960_p9 = scmp.lt.u32.totalorder %s1207_s4, %s1356_s0 }
  0x39   : > { %p957_p5 = pnand %p956_p3, %p955_p0  ;;  %p961_p1 = scmp.lt.u32.totalorder %s959_s22, %s954_s8 }
  0x3a   : > { %p963_p4 = scmp.lt.u32.totalorder %s954_s8, %s1207_s4 }
  0x3b   : > { %p958_p7 = pneg %p957_p5  ;;  %p962_p2 = por %p961_p1, %p960_p9 }
  0x3d   : > { %p964_p6 = por %p963_p4, %p962_p2 }
  0x3f   : > { %p965_p8 = pnand %p964_p6, %p958_p7 }
  0x41   : > { %968 = shalt.err (!%p965_p8)
}
  0x42   : > { %s969_s23 = scalar_lea.vmem %s1209_s5, 2048  ;;  %s1075_s29 = smov [#allocation2]  }
  0x43   : > { %p970_p12 = scmp.ne.s32.totalorder %s1209_s5, %s969_s23  ;;  %s974_s30 = sshll.u32 %s1075_s29, 4  ;;  %s975_s30 = int_to_ptr.vmem [resolvable:$false] %s974_s30 }
  0x44   : > { %s976_s3 = scalar_lea.vmem %s975_s30, 4096  ;;  %p977_p5 = scmp.lt.s32.totalorder %s1209_s5, %s975_s30 }
  0x45   : > { %p972_p11 = pnand %p970_p12, %p956_p3  ;;  %p978_p9 = scmp.lt.s32.totalorder %s976_s3, %s969_s23 }
  0x47   : > { %p973_p0 = pneg %p972_p11  ;;  %p979_p1 = por %p978_p9, %p977_p5 }
  0x49   : > { %p980_p2 = pnand %p979_p1, %p973_p0 }
  0x4b   : > { %983 = shalt.err (!%p980_p2)
}
  0x4c   : > { %s1076_s18 = smov 128   ;;  %s1077_s8 = smov 8  }
  0x4d   : > { %822 = dma.hbm_to_vmem [thread:$0]  (!%p1213_p13), %s1207_s4, 2048, %s1209_s5, %s1217_s7, %s1076_s18, %s1076_s18, %s1077_s8  }
  0x4e   : > { %p1373_p3 = scmp.ne.s32.totalorder %s1367_s21, 0 }
  0x4f   : > { %s1248_s15 = sand.u32 (!%p1373_p3), 1, %s1054_s10   ;;  %p1374_p7 = scmp.ne.s32.totalorder (!%p1373_p3), %s1365_s19, 0 }
  0x50   : > { %183 = sbr.rel (%p1373_p3) target bundleno = 380 (0x17c), region = 28  ;;  %s684_s16 = sshll.u32 (!%p1373_p3), %s1248_s15, 7 }
  0x51   : > { %s186_s22 = scalar_lea.sflag (!%p1373_p3), [#allocation3], %s1248_s15  ;;  %s1254_s24 = scalar_lea.vmem (!%p1373_p3), [#allocation2], %s684_s16 }
  0x57   : > { %1037 = dma.done.wait (%p1374_p7), %s186_s22, 2048  }
  0x58   : > { %1039 = vsyncadd (%p1374_p7), %s186_s22, 4294965248  ;;  %p1375_p13 = scmp.ne.s32.totalorder %s1363_s17, 0 }
  0x5a   : > { %1041 = dma.done.wait (%p1375_p13), [#allocation6], 2048  }
  0x5b   : > { %1043 = vsyncadd (%p1375_p13), [#allocation6], 4294965248  ;;  %v886_v0 = vld [vmem:[#allocation5 + $0x40] sm:$0xff]   ;;  %v888_v2 = vld [vmem:[#allocation5 + $0x48] sm:$0xff]   ;;  %s1282_s17 = scalar_lea.vmem [#allocation7], %s684_s16  ;;  %s726_s19 = sshll.u32 %s1062_s12, 11 }
  0x5c   : > { %v887_v1 = vld [vmem:[#allocation5] sm:$0xff]   ;;  %727 = vmatprep.subr.bf16.mxu0 %v886_v0  ;;  %791 = vmatprep.subr.bf16.mxu1 %v886_v0  ;;  %v889_v3 = vld [vmem:[#allocation5 + $0x8] sm:$0xff]   ;;  %v890_v4 = vld [vmem:[#allocation5 + $0x50] sm:$0xff]   ;;  %s571_s21 = sshll.u32 %s1282_s17, 4  ;;  %s1301_s6 = scalar_lea.hbm %s1358_s2, %s726_s19  ;;  %s1303_s21 = int_to_ptr.vmem [resolvable:$true] %s571_s21 }
  0x5d   : > { %728 = vmatpush3.bf16.msra.mxu0 %v887_v1  ;;  %799 = vmatpush3.bf16.msra.mxu1 %v887_v1  ;;  %v891_v5 = vld [vmem:[#allocation5 + $0x10] sm:$0xff]   ;;  %v892_v6 = vld [vmem:[#allocation5 + $0x58] sm:$0xff]   ;;  %v894_v8 = vld [vmem:[#allocation5 + $0x60] sm:$0xff]   ;;  %s557_s12 = scalar_lea.sflag [#allocation4], %s1248_s15  ;;  %s984_s7 = scalar_lea.vmem %s1303_s21, 2048 }
  0x5e   : > { %729 = vmatprep.subr.bf16.mxu0 %v888_v2  ;;  %792 = vmatprep.subr.bf16.mxu1 %v888_v2  ;;  %v893_v7 = vld [vmem:[#allocation5 + $0x18] sm:$0xff]   ;;  %v895_v9 = vld [vmem:[#allocation5 + $0x20] sm:$0xff]   ;;  %v896_v10 = vld [vmem:[#allocation5 + $0x68] sm:$0xff]   ;;  %p985_p4 = scmp.ne.s32.totalorder %s1303_s21, %s984_s7  ;;  %s1078_s27 = smov [#allocation7]  }
  0x5f   : > { %v904_v11 = vld [vmem:[%s1254_s24 + $0x4] ss:$8 sps:$4 sm:$0xff]   ;;  %v898_v14 = vld [vmem:[#allocation5 + $0x70] sm:$0xff]   ;;  %v900_v16 = vld [vmem:[#allocation5 + $0x78] sm:$0xff]   ;;  %s988_s23 = sshll.u32 %s1078_s27, 4  ;;  %s989_s23 = int_to_ptr.vmem [resolvable:$false] %s988_s23 }
  0x60   : > { %v907_v12 = vld [vmem:[%s1254_s24 + $0x44] ss:$8 sps:$4 sm:$0xff]   ;;  %475 = vmatprep.mubr.bf16.mxu0 %v904_v11  ;;  %v899_v15 = vld [vmem:[#allocation5 + $0x30] sm:$0xff]   ;;  %v901_v17 = vld [vmem:[#allocation5 + $0x38] sm:$0xff]   ;;  %p986_p6 = pnand %p985_p4, %p1192_p10  ;;  %s990_s29 = scalar_lea.vmem %s989_s23, 4096 }
  0x61   : > { %730 = vmatpush3.bf16.msra.mxu0 %v889_v3  ;;  %800 = vmatpush3.bf16.msra.mxu1 %v889_v3  ;;  %v897_v13 = vld [vmem:[#allocation5 + $0x28] sm:$0xff]   ;;  %v908_v20 = vld [vmem:[%s1254_s24 + $0x14] ss:$8 sps:$4 sm:$0xff]   ;;  %v912_v22 = vld [vmem:[%s1254_s24 + $0x10] ss:$8 sps:$4 sm:$0xff]   ;;  %p991_p12 = scmp.lt.s32.totalorder %s1303_s21, %s989_s23  ;;  %p992_p11 = scmp.lt.s32.totalorder %s990_s29, %s984_s7 }
  0x62   : > { %731 = vmatprep.subr.bf16.mxu0 %v890_v4  ;;  %793 = vmatprep.subr.bf16.mxu1 %v890_v4  ;;  %v902_v18 = vld [vmem:[%s1254_s24] ss:$8 sps:$4 sm:$0xff]   ;;  %v910_v21 = vld [vmem:[%s1254_s24 + $0x54] ss:$8 sps:$4 sm:$0xff]   ;;  %v913_v23 = vld [vmem:[%s1254_s24 + $0x50] ss:$8 sps:$4 sm:$0xff]   ;;  %p987_p8 = pneg %p986_p6 }
  0x63   : > { %507 = vmatprep.mubr.bf16.mxu1 %v907_v12  ;;  %v905_v19 = vld [vmem:[%s1254_s24 + $0x40] ss:$8 sps:$4 sm:$0xff]   ;;  %v914_v24 = vld [vmem:[%s1254_s24 + $0x24] ss:$8 sps:$4 sm:$0xff]   ;;  %v920_v28 = vld [vmem:[%s1254_s24 + $0x34] ss:$8 sps:$4 sm:$0xff]   ;;  %p993_p0 = por %p992_p11, %p991_p12 }
  0x64   : > { %v916_v25 = vld [vmem:[%s1254_s24 + $0x64] ss:$8 sps:$4 sm:$0xff]   ;;  %v918_v26 = vld [vmem:[%s1254_s24 + $0x20] ss:$8 sps:$4 sm:$0xff]   ;;  %v922_v29 = vld [vmem:[%s1254_s24 + $0x74] ss:$8 sps:$4 sm:$0xff]  }
  0x65   : > { %732 = vmatpush3.bf16.msra.mxu0 %v891_v5  ;;  %801 = vmatpush3.bf16.msra.mxu1 %v891_v5  ;;  %v919_v27 = vld [vmem:[%s1254_s24 + $0x60] ss:$8 sps:$4 sm:$0xff]   ;;  %v924_v30 = vld [vmem:[%s1254_s24 + $0x30] ss:$8 sps:$4 sm:$0xff]   ;;  %p994_p5 = pnand %p993_p0, %p987_p8 }
  0x66   : > { %733 = vmatprep.subr.bf16.mxu0 %v892_v6  ;;  %794 = vmatprep.subr.bf16.mxu1 %v892_v6  ;;  %v925_v31 = vld [vmem:[%s1254_s24 + $0x70] ss:$8 sps:$4 sm:$0xff]  }
  0x69   : > { %734 = vmatpush3.bf16.msra.mxu0 %v893_v7  ;;  %802 = vmatpush3.bf16.msra.mxu1 %v893_v7 }
  0x6a   : > { %735 = vmatprep.subr.bf16.mxu0 %v894_v8  ;;  %795 = vmatprep.subr.bf16.mxu1 %v894_v8 }
  0x6d   : > { %736 = vmatpush3.bf16.msra.mxu0 %v895_v9  ;;  %803 = vmatpush3.bf16.msra.mxu1 %v895_v9 }
  0x6e   : > { %737 = vmatprep.subr.bf16.mxu0 %v896_v10  ;;  %796 = vmatprep.subr.bf16.mxu1 %v896_v10 }
  0x71   : > { %738 = vmatpush3.bf16.msra.mxu0 %v897_v13  ;;  %804 = vmatpush3.bf16.msra.mxu1 %v897_v13 }
  0x72   : > { %739 = vmatprep.subr.bf16.mxu0 %v898_v14  ;;  %797 = vmatprep.subr.bf16.mxu1 %v898_v14 }
  0x75   : > { %740 = vmatpush3.bf16.msra.mxu0 %v899_v15  ;;  %805 = vmatpush3.bf16.msra.mxu1 %v899_v15 }
  0x76   : > { %741 = vmatprep.subr.bf16.mxu0 %v900_v16  ;;  %798 = vmatprep.subr.bf16.mxu1 %v900_v16 }
  0x79   : > { %742 = vmatpush3.bf16.msra.mxu0 %v901_v17  ;;  %806 = vmatpush3.bf16.msra.mxu1 %v901_v17 }
  0x7c   : > { %476 = vmatmul.mubr.bf16.vlgmr.msra.gmra.mrb[0].mxu0 %v902_v18  ;;  %508 = vmatmul.mubr.bf16.vlgmr.msra.gmra.mrb[0].mxu1 %v905_v19 }
  0x7d   : > { %483 = vmatprep.mubr.bf16.mxu0 %v908_v20  ;;  %515 = vmatprep.mubr.bf16.mxu1 %v910_v21 }
  0x84   : > { %484 = vmatmul.mubr.bf16.gmra.mrb[4].mxu0 %v912_v22  ;;  %516 = vmatmul.mubr.bf16.gmra.mrb[4].mxu1 %v913_v23 }
  0x85   : > { %491 = vmatprep.mubr.bf16.mxu0 %v914_v24  ;;  %523 = vmatprep.mubr.bf16.mxu1 %v916_v25 }
  0x8c   : > { %492 = vmatmul.mubr.bf16.gmra.mrb[8].mxu0 %v918_v26  ;;  %524 = vmatmul.mubr.bf16.gmra.mrb[8].mxu1 %v919_v27 }
  0x8d   : > { %499 = vmatprep.mubr.bf16.mxu0 %v920_v28  ;;  %531 = vmatprep.mubr.bf16.mxu1 %v922_v29 }
  0x94   : > { %500 = vmatmul.mubr.bf16.gmra.mrb[12].mxu0 %v924_v30  ;;  %532 = vmatmul.mubr.bf16.gmra.mrb[12].mxu1 %v925_v31 }
 0x14f   : > { %v743_v32 = vpop.f32.mrb[0].mxu0  ;;  %v767_v33 = vpop.f32.mrb[0].mxu1 }
 0x150   : > { %v744_v34 = vpop.f32.mrb[1].mxu0  ;;  %v768_v35 = vpop.f32.mrb[1].mxu1 }
 0x151   : > { %v745_v36 = vadd.f32 %v744_v34, %v743_v32  ;;  %v769_v37 = vadd.f32 %v768_v35, %v767_v33  ;;  %v746_v38 = vpop.f32.mrb[2].mxu0  ;;  %v770_v39 = vpop.f32.mrb[2].mxu1 }
 0x152   : > { %v747_v40 = vpop.f32.mrb[3].mxu0  ;;  %v771_v41 = vpop.f32.mrb[3].mxu1 }
 0x153   : > { %540 = vst [vmem:[%s1282_s17] sm:$0xff] %v745_v36  ;;  %548 = vst [vmem:[%s1282_s17 + $0x40] sm:$0xff] %v769_v37  ;;  %v748_v42 = vadd.f32 %v747_v40, %v746_v38  ;;  %v772_v43 = vadd.f32 %v771_v41, %v770_v39 }
 0x155   : > { %541 = vst [vmem:[%s1282_s17 + $0x8] sm:$0xff] %v748_v42  ;;  %549 = vst [vmem:[%s1282_s17 + $0x48] sm:$0xff] %v772_v43 }
 0x157   : > { %v749_v44 = vpop.f32.mrb[4].mxu0  ;;  %v773_v45 = vpop.f32.mrb[4].mxu1 }
 0x158   : > { %v750_v46 = vpop.f32.mrb[5].mxu0  ;;  %v774_v47 = vpop.f32.mrb[5].mxu1 }
 0x159   : > { %v751_v48 = vadd.f32 %v750_v46, %v749_v44  ;;  %v775_v49 = vadd.f32 %v774_v47, %v773_v45  ;;  %v752_v50 = vpop.f32.mrb[6].mxu0  ;;  %v776_v51 = vpop.f32.mrb[6].mxu1 }
 0x15a   : > { %v753_v52 = vpop.f32.mrb[7].mxu0  ;;  %v777_v53 = vpop.f32.mrb[7].mxu1 }
 0x15b   : > { %542 = vst [vmem:[%s1282_s17 + $0x10] sm:$0xff] %v751_v48  ;;  %550 = vst [vmem:[%s1282_s17 + $0x50] sm:$0xff] %v775_v49  ;;  %v754_v54 = vadd.f32 %v753_v52, %v752_v50  ;;  %v778_v55 = vadd.f32 %v777_v53, %v776_v51 }
 0x15d   : > { %543 = vst [vmem:[%s1282_s17 + $0x18] sm:$0xff] %v754_v54  ;;  %551 = vst [vmem:[%s1282_s17 + $0x58] sm:$0xff] %v778_v55 }
 0x15f   : > { %v755_v56 = vpop.f32.mrb[8].mxu0  ;;  %v779_v57 = vpop.f32.mrb[8].mxu1 }
 0x160   : > { %v756_v58 = vpop.f32.mrb[9].mxu0  ;;  %v780_v59 = vpop.f32.mrb[9].mxu1 }
 0x161   : > { %v757_v60 = vadd.f32 %v756_v58, %v755_v56  ;;  %v781_v61 = vadd.f32 %v780_v59, %v779_v57  ;;  %v758_v62 = vpop.f32.mrb[10].mxu0  ;;  %v782_v63 = vpop.f32.mrb[10].mxu1 }
 0x162   : > { %v759_v0 = vpop.f32.mrb[11].mxu0  ;;  %v783_v1 = vpop.f32.mrb[11].mxu1 }
 0x163   : > { %544 = vst [vmem:[%s1282_s17 + $0x20] sm:$0xff] %v757_v60  ;;  %552 = vst [vmem:[%s1282_s17 + $0x60] sm:$0xff] %v781_v61  ;;  %v760_v2 = vadd.f32 %v759_v0, %v758_v62  ;;  %v784_v3 = vadd.f32 %v783_v1, %v782_v63 }
 0x165   : > { %545 = vst [vmem:[%s1282_s17 + $0x28] sm:$0xff] %v760_v2  ;;  %553 = vst [vmem:[%s1282_s17 + $0x68] sm:$0xff] %v784_v3 }
 0x167   : > { %v761_v4 = vpop.f32.mrb[12].mxu0  ;;  %v785_v5 = vpop.f32.mrb[12].mxu1 }
 0x168   : > { %v762_v6 = vpop.f32.mrb[13].mxu0  ;;  %v786_v7 = vpop.f32.mrb[13].mxu1 }
 0x169   : > { %v763_v8 = vadd.f32 %v762_v6, %v761_v4  ;;  %v787_v9 = vadd.f32 %v786_v7, %v785_v5  ;;  %v764_v10 = vpop.f32.mrb[14].mxu0  ;;  %v788_v11 = vpop.f32.mrb[14].mxu1 }
 0x16a   : > { %v765_v12 = vpop.f32.mrb[15].mxu0  ;;  %v789_v13 = vpop.f32.mrb[15].mxu1 }
 0x16b   : > { %546 = vst [vmem:[%s1282_s17 + $0x30] sm:$0xff] %v763_v8  ;;  %554 = vst [vmem:[%s1282_s17 + $0x70] sm:$0xff] %v787_v9  ;;  %v766_v14 = vadd.f32 %v765_v12, %v764_v10  ;;  %v790_v15 = vadd.f32 %v789_v13, %v788_v11 }
 0x16d   : > { %547 = vst [vmem:[%s1282_s17 + $0x38] sm:$0xff] %v766_v14  ;;  %555 = vst [vmem:[%s1282_s17 + $0x78] sm:$0xff] %v790_v15 }
 0x16e   : > { %997 = shalt.err (!%p994_p5)
}
 0x16f   : > { %s998_s30 = scalar_lea.hbm %s1301_s6, 2048  ;;  %s1002_s8 = scalar_lea.hbm %s1358_s2, 4096 }
 0x170   : > { %p999_p9 = scmp.ne.s32.totalorder %s1301_s6, %s998_s30  ;;  %p1003_p3 = scmp.lt.u32.totalorder %s1301_s6, %s1358_s2 }
 0x171   : > { %p1004_p7 = scmp.lt.u32.totalorder %s1002_s8, %s998_s30  ;;  %p1006_p4 = scmp.lt.u32.totalorder %s998_s30, %s1301_s6 }
 0x172   : > { %p1000_p1 = pnand %p999_p9, %p1192_p10 }
 0x173   : > { %p1005_p13 = por %p1004_p7, %p1003_p3 }
 0x174   : > { %p1001_p2 = pneg %p1000_p1 }
 0x175   : > { %p1007_p6 = por %p1006_p4, %p1005_p13 }
 0x177   : > { %p1008_p8 = pnand %p1007_p6, %p1001_p2 }
 0x179   : > { %1011 = shalt.err (!%p1008_p8)
}
 0x17a   : > { %s1079_s24 = smov 128   ;;  %s1080_s17 = smov 8  }
 0x17b   : > { %813 = dma.vmem_to_hbm [thread:$0]  (%p1192_p10), %s1303_s21, 2048, %s1301_s6, %s557_s12, %s1079_s24, %s1079_s24, %s1080_s17  }
 0x17c PF: > { %s586_s19 = sand.u32 1, %s1050_s9   ;;  %p1376_p12 = scmp.ne.s32.totalorder %s1366_s20, 0 }
 0x17d   : > { %p1377_p11 = scmp.ge.s32.totalorder %s1070_s14, 2  ;;  %s587_s4 = scalar_lea.sflag [#allocation4], %s586_s19 }
 0x17f   : > { %p824_p0 = pnand %p1377_p11, %p1376_p12 }
 0x181   : > { %1045 = dma.done.wait (!%p824_p0), %s587_s4, 2048  }
 0x182   : > { %1047 = vsyncadd (!%p824_p0), %s587_s4, 4294965248  ;;  %s19_s14 = sadd.s32 1, %s1070_s14   ;;  %s1378_s9 = smov %s1054_s10 }
 0x183   : > { %p16_p5 = scmp.ge.s32.totalorder %s19_s14, 4   ;;  %s1379_s10 = smov %s1058_s11 }
 0x184   : > { %s1380_s11 = smov %s1201_s28  ;;  %s1381_s12 = smov %s1066_s13 }
 0x185   : > { %s1382_s13 = smov %s1384_s25  ;;  %18 = sbr.rel (!%p16_p5) target bundleno = 7 (0x7), region = 78 }
 0x18c   :  { %592 = vsyncpa [#allocation3], 1 }
 0x18d   :  { %594 = vsyncpa [#allocation3 + $0x1], 1 }
 0x18e   :  { %595 = vsyncpa [#allocation6], 1 }
 0x18f   :  { %596 = vsyncpa [#allocation4], 1 }
 0x190   :  { %598 = vsyncpa [#allocation4 + $0x1], 1 }

</bundles_post_ra>
